<compile_context>
chip_gen: v7x
topology: tpu7x:2x2x1
jax: 0.10.0
libtpu: 0.0.40
codegen_flags: <defaults>
</compile_context>

<pallas_src>
import functools

import jax
import jax.numpy as jnp
from jax.experimental import pallas as pl
from jax.experimental.pallas import tpu as pltpu

HIDDEN = 32      # nn.Linear(1, 32)
LANES = 128      # TPU lane width
N_PARTIAL = 4    # independent accumulators (breaks the 32-deep dependent add chain)


# ---------------------------------------------------------------------------
# Pallas kernel: fused  Linear(1,32) -> ReLU -> Linear(32,1) -> sigmoid
#                -> range select   on a (row_tile, 128) lane-dense tile
# ---------------------------------------------------------------------------
def _comm_mask_kernel(params_ref, d_ref, o_ref, *, chunk, use_bf16):
    # params_ref : SMEM (4, HIDDEN) f32, rows = [w1/R, b1, w2, (b2, R, 0, ...)]
    # d_ref/o_ref: VMEM (row_tile, 128) f32
    cdt = jnp.bfloat16 if use_bf16 else jnp.float32
    b2 = params_ref[3, 0]
    r = params_ref[3, 1]                      # communication range (runtime scalar)
    n_chunks = d_ref.shape[0] // chunk

    # Process the tile in small (chunk, 128) sub-blocks so the long elementwise
    # chain stays in vregs (never spills whole-tile intermediates to VMEM).
    @pl.loop(0, n_chunks)
    def _(c):
        off = pl.multiple_of(c * chunk, chunk)
        d = d_ref[pl.ds(off, chunk), :]                       # raw distances, f32
        x = d.astype(cdt)

        # sum_j w2[j] * relu(d * (w1[j]/R) + b1[j])  + b2   (b2 folded into acc0)
        accs = [jnp.broadcast_to(b2.astype(cdt), x.shape)] + \
               [jnp.zeros(x.shape, cdt) for _ in range(N_PARTIAL - 1)]
        for j in range(HIDDEN):                               # unrolled; scalars from SMEM
            w1j = params_ref[0, j].astype(cdt)                # already pre-scaled by 1/R
            b1j = params_ref[1, j].astype(cdt)
            w2j = params_ref[2, j].astype(cdt)
            accs[j % N_PARTIAL] = accs[j % N_PARTIAL] + \
                jnp.maximum(x * w1j + b1j, 0.0) * w2j

        z = ((accs[0].astype(jnp.float32) + accs[1].astype(jnp.float32)) +
             (accs[2].astype(jnp.float32) + accs[3].astype(jnp.float32)))

        # sigmoid via tanh: single EUP transcendental, no VALU divide
        quality = 0.5 * jnp.tanh(0.5 * z) + 0.5

        # fused range mask; quality in (0,1) so the torch clamp is a no-op here.
        # (diagonal +1 -> exactly 1.0 is written by the wrapper after the kernel)
        o_ref[pl.ds(off, chunk), :] = jnp.where(d <= r, quality, 0.0)


# ---------------------------------------------------------------------------
# Tile selection: big tiles, but an even number of grid steps for v7x's 2 TCs
# ---------------------------------------------------------------------------
def _choose_tile(rows8, row_tile):
    """rows8 is a multiple of 8.  Returns rows-per-grid-step (multiple of 8).

    Preference: (a) even step count (v7x shards the 'parallel' axis over 2 TCs),
    (b) >= 4 steps when there is enough work (>= 2 per core, hides first DMA),
    (c) fewest steps among those (amortize ~0.35us/step), smallest tile on ties
    (least padding).  Never creates padding-only steps.
    """
    if rows8 <= 8:
        return rows8
    row_tile = max(8, (row_tile // 8) * 8)
    max_steps = rows8 // 8

    def score(tile):
        steps = -(-rows8 // tile)
        return (steps % 2 == 0, steps >= min(4, max_steps), -steps)

    best = min(row_tile, rows8)
    for t in range(8, min(row_tile, rows8) + 1, 8):
        if score(t) > score(best):
            best = t
    return best


# ---------------------------------------------------------------------------
# Wrapper: lane-dense repacking, tiling, pallas_call, diagonal writeback
# ---------------------------------------------------------------------------
def communication_constraint_forward(distance_matrix, params, *,
                                     communication_range=100.0,
                                     row_tile=1024, use_bf16=False):
    B, A, A2 = distance_matrix.shape
    assert A == A2, "distance matrix must be square per batch"
    n = B * A * A

    rows = -(-n // LANES)                        # ceil(n / 128)
    rows8 = max(8, -(-rows // 8) * 8)            # sublane-align
    tile = _choose_tile(rows8, row_tile)
    rows_p = -(-rows8 // tile) * tile
    pad = rows_p * LANES - n

    # --- lane-dense distance slab; skip the pad copy when already aligned ---
    d = distance_matrix.astype(jnp.float32)
    if pad == 0:
        d_flat = d.reshape(rows_p, LANES)
    else:
        d_flat = jnp.pad(d.reshape(-1), (0, pad)).reshape(rows_p, LANES)

    # --- pack all MLP constants (w1 pre-scaled by 1/R) + R into one SMEM input ---
    packed = jnp.zeros((4, HIDDEN), jnp.float32)
    packed = packed.at[0].set(params["w1"].astype(jnp.float32) / communication_range)
    packed = packed.at[1].set(params["b1"].astype(jnp.float32))
    packed = packed.at[2].set(params["w2"].astype(jnp.float32))
    packed = packed.at[3, 0].set(params["b2"].astype(jnp.float32))
    packed = packed.at[3, 1].set(jnp.float32(communication_range))

    chunk = 32 if tile % 32 == 0 else (16 if tile % 16 == 0 else 8)
    kernel = functools.partial(_comm_mask_kernel, chunk=chunk, use_bf16=use_bf16)

    out = pl.pallas_call(
        kernel,
        out_shape=jax.ShapeDtypeStruct((rows_p, LANES), jnp.float32),
        grid=(rows_p // tile,),
        in_specs=[
            pl.BlockSpec(memory_space=pltpu.MemorySpace.SMEM),   # packed MLP weights
            pl.BlockSpec((tile, LANES), lambda i: (i, 0)),       # distance slab tile
        ],
        out_specs=pl.BlockSpec((tile, LANES), lambda i: (i, 0)),
        compiler_params=pltpu.CompilerParams(dimension_semantics=("parallel",)),
    )(packed, d_flat)

    flat = out.reshape(-1)
    if pad:
        flat = flat[:n]
    mask = flat.reshape(B, A, A)

    # torch semantics: diagonal = clamp(sigmoid(..) + 1, 0, 1) == exactly 1.0;
    # off-diagonal zero distances keep in_range*quality (no +1), as in torch.
    idx = jnp.arange(A)
    return mask.at[:, idx, idx].set(1.0)


# ---------------------------------------------------------------------------
# Pure-JAX reference (same math, no Pallas) for the correctness check
# ---------------------------------------------------------------------------
def communication_constraint_reference(distance_matrix, params, *, communication_range=100.0):
    B, A, _ = distance_matrix.shape
    dn = distance_matrix / communication_range
    h = jnp.maximum(dn[..., None] * params["w1"] + params["b1"], 0.0)     # [B,A,A,32]
    z = jnp.sum(h * params["w2"], axis=-1) + params["b2"]                 # [B,A,A]
    quality = jax.nn.sigmoid(z)
    in_range = (distance_matrix <= communication_range).astype(jnp.float32)
    mask = in_range * quality + jnp.eye(A, dtype=jnp.float32)[None]
    return jnp.clip(mask, 0.0, 1.0)


# ---------------------------------------------------------------------------
def init_params(key):
    """PyTorch-default-style init for Linear(1,32) and Linear(32,1)."""
    k1, k2, k3, k4 = jax.random.split(key, 4)
    lim1 = 1.0                                    # 1/sqrt(fan_in=1)
    lim2 = 1.0 / float(jnp.sqrt(float(HIDDEN)))
    return dict(
        w1=jax.random.uniform(k1, (HIDDEN,), jnp.float32, -lim1, lim1),
        b1=jax.random.uniform(k2, (HIDDEN,), jnp.float32, -lim1, lim1),
        w2=jax.random.uniform(k3, (HIDDEN,), jnp.float32, -lim2, lim2),
        b2=jax.random.uniform(k4, (), jnp.float32, -lim2, lim2),
    )


if __name__ == "__main__":
    R = 100.0
    key = jax.random.PRNGKey(0)
    k_pos, k_par = jax.random.split(key)
    params = init_params(k_par)

    # --- main case: B=2, A=8, some pairs beyond the 100 m range ---
    B, A = 2, 8
    positions = jax.random.uniform(k_pos, (B, A, 3), jnp.float32, 0.0, 150.0)
    diff = positions[:, :, None, :] - positions[:, None, :, :]
    distance_matrix = jnp.sqrt(jnp.sum(diff * diff, axis=-1))   # zero diagonal

    ref = communication_constraint_reference(distance_matrix, params, communication_range=R)

    out = communication_constraint_forward(distance_matrix, params, communication_range=R)
    out = jax.block_until_ready(out)
    assert out.shape == (B, A, A)
    assert jnp.allclose(out, ref, atol=1e-4, rtol=1e-4), "f32 mismatch vs JAX reference"

    # bf16 inner-loop path (v6e/v7x perf option); lower precision by design.
    out_bf16 = communication_constraint_forward(distance_matrix, params,
                                                communication_range=R, use_bf16=True)
    out_bf16 = jax.block_until_ready(out_bf16)
    assert jnp.allclose(out_bf16, ref, atol=5e-2, rtol=5e-2), "bf16 mismatch vs JAX reference"

    # --- odd-shaped case to exercise tiling / tail padding / slicing ---
    B2, A2 = 1, 37
    pos2 = jax.random.uniform(jax.random.PRNGKey(1), (B2, A2, 3), jnp.float32, 0.0, 150.0)
    diff2 = pos2[:, :, None, :] - pos2[:, None, :, :]
    dm2 = jnp.sqrt(jnp.sum(diff2 * diff2, axis=-1))
    out2 = communication_constraint_forward(dm2, params, communication_range=R)
    out2 = jax.block_until_ready(out2)
    ref2 = communication_constraint_reference(dm2, params, communication_range=R)
    assert jnp.allclose(out2, ref2, atol=1e-4, rtol=1e-4), "odd-shape mismatch vs JAX reference"

    print("KERNEL_OK")
</pallas_src>

<mosaic_0001>
module attributes {stable_mosaic.version = 11 : i64} {
  func.func @_comm_mask_kernel(%arg0: i32, %arg1: memref<4x32xf32, #tpu.memory_space<smem>>, %arg2: memref<8x128xf32, #tpu.memory_space<vmem>>, %arg3: memref<8x128xf32, #tpu.memory_space<vmem>>) attributes {dimension_semantics = [#tpu.dimension_semantics<parallel>], iteration_bounds = array<i64: 1>, scalar_prefetch = 0 : i64, scratch_operands = 0 : i64, tpu.core_type = #tpu.core_type<tc>, window_params = [{transform_indices = @transform_0, window_bounds = array<i64: 4, 32>}, {transform_indices = @transform_1, window_bounds = array<i64: 8, 128>}, {transform_indices = @transform_2, window_bounds = array<i64: 8, 128>}]} {
    %c3 = arith.constant 3 : index
    %c0 = arith.constant 0 : index
    %0 = memref.load %arg1[%c3, %c0] : memref<4x32xf32, #tpu.memory_space<smem>>
    %c3_0 = arith.constant 3 : index
    %c1 = arith.constant 1 : index
    %1 = memref.load %arg1[%c3_0, %c1] : memref<4x32xf32, #tpu.memory_space<smem>>
    %c0_i32 = arith.constant 0 : i32
    %c1_i32 = arith.constant 1 : i32
    %2 = arith.muli %c0_i32, %c1_i32 : i32
    %c0_i32_1 = arith.constant 0 : i32
    %3 = arith.addi %c0_i32_1, %2 : i32
    %c8_i32 = arith.constant 8 : i32
    %4 = arith.muli %3, %c8_i32 : i32
    %5 = tpu.assume_multiple %4, 8 : i32
    %6 = arith.index_cast %5 : i32 to index
    %c0_2 = arith.constant 0 : index
    %7 = vector.load %arg2[%6, %c0_2] : memref<8x128xf32, #tpu.memory_space<vmem>>, vector<8x128xf32>
    %8 = vector.broadcast %0 : f32 to vector<8x128xf32>
    %cst = arith.constant 0.000000e+00 : f32
    %9 = vector.broadcast %cst : f32 to vector<8x128xf32>
    %cst_3 = arith.constant 0.000000e+00 : f32
    %10 = vector.broadcast %cst_3 : f32 to vector<8x128xf32>
    %cst_4 = arith.constant 0.000000e+00 : f32
    %11 = vector.broadcast %cst_4 : f32 to vector<8x128xf32>
    %c0_5 = arith.constant 0 : index
    %c0_6 = arith.constant 0 : index
    %12 = memref.load %arg1[%c0_5, %c0_6] : memref<4x32xf32, #tpu.memory_space<smem>>
    %c1_7 = arith.constant 1 : index
    %c0_8 = arith.constant 0 : index
    %13 = memref.load %arg1[%c1_7, %c0_8] : memref<4x32xf32, #tpu.memory_space<smem>>
    %c2 = arith.constant 2 : index
    %c0_9 = arith.constant 0 : index
    %14 = memref.load %arg1[%c2, %c0_9] : memref<4x32xf32, #tpu.memory_space<smem>>
    %15 = vector.broadcast %12 : f32 to vector<8x128xf32>
    %16 = arith.mulf %7, %15 : vector<8x128xf32>
    %17 = vector.broadcast %13 : f32 to vector<8x128xf32>
    %18 = arith.addf %16, %17 : vector<8x128xf32>
    %cst_10 = arith.constant 0.000000e+00 : f32
    %19 = vector.broadcast %cst_10 : f32 to vector<8x128xf32>
    %20 = arith.maximumf %18, %19 : vector<8x128xf32>
    %21 = vector.broadcast %14 : f32 to vector<8x128xf32>
    %22 = arith.mulf %20, %21 : vector<8x128xf32>
    %23 = arith.addf %8, %22 : vector<8x128xf32>
    %c0_11 = arith.constant 0 : index
    %c1_12 = arith.constant 1 : index
    %24 = memref.load %arg1[%c0_11, %c1_12] : memref<4x32xf32, #tpu.memory_space<smem>>
    %c1_13 = arith.constant 1 : index
    %c1_14 = arith.constant 1 : index
    %25 = memref.load %arg1[%c1_13, %c1_14] : memref<4x32xf32, #tpu.memory_space<smem>>
    %c2_15 = arith.constant 2 : index
    %c1_16 = arith.constant 1 : index
    %26 = memref.load %arg1[%c2_15, %c1_16] : memref<4x32xf32, #tpu.memory_space<smem>>
    %27 = vector.broadcast %24 : f32 to vector<8x128xf32>
    %28 = arith.mulf %7, %27 : vector<8x128xf32>
    %29 = vector.broadcast %25 : f32 to vector<8x128xf32>
    %30 = arith.addf %28, %29 : vector<8x128xf32>
    %cst_17 = arith.constant 0.000000e+00 : f32
    %31 = vector.broadcast %cst_17 : f32 to vector<8x128xf32>
    %32 = arith.maximumf %30, %31 : vector<8x128xf32>
    %33 = vector.broadcast %26 : f32 to vector<8x128xf32>
    %34 = arith.mulf %32, %33 : vector<8x128xf32>
    %35 = arith.addf %9, %34 : vector<8x128xf32>
    %c0_18 = arith.constant 0 : index
    %c2_19 = arith.constant 2 : index
    %36 = memref.load %arg1[%c0_18, %c2_19] : memref<4x32xf32, #tpu.memory_space<smem>>
    %c1_20 = arith.constant 1 : index
    %c2_21 = arith.constant 2 : index
    %37 = memref.load %arg1[%c1_20, %c2_21] : memref<4x32xf32, #tpu.memory_space<smem>>
    %c2_22 = arith.constant 2 : index
    %c2_23 = arith.constant 2 : index
    %38 = memref.load %arg1[%c2_22, %c2_23] : memref<4x32xf32, #tpu.memory_space<smem>>
    %39 = vector.broadcast %36 : f32 to vector<8x128xf32>
    %40 = arith.mulf %7, %39 : vector<8x128xf32>
    %41 = vector.broadcast %37 : f32 to vector<8x128xf32>
    %42 = arith.addf %40, %41 : vector<8x128xf32>
    %cst_24 = arith.constant 0.000000e+00 : f32
    %43 = vector.broadcast %cst_24 : f32 to vector<8x128xf32>
    %44 = arith.maximumf %42, %43 : vector<8x128xf32>
    %45 = vector.broadcast %38 : f32 to vector<8x128xf32>
    %46 = arith.mulf %44, %45 : vector<8x128xf32>
    %47 = arith.addf %10, %46 : vector<8x128xf32>
    %c0_25 = arith.constant 0 : index
    %c3_26 = arith.constant 3 : index
    %48 = memref.load %arg1[%c0_25, %c3_26] : memref<4x32xf32, #tpu.memory_space<smem>>
    %c1_27 = arith.constant 1 : index
    %c3_28 = arith.constant 3 : index
    %49 = memref.load %arg1[%c1_27, %c3_28] : memref<4x32xf32, #tpu.memory_space<smem>>
    %c2_29 = arith.constant 2 : index
    %c3_30 = arith.constant 3 : index
    %50 = memref.load %arg1[%c2_29, %c3_30] : memref<4x32xf32, #tpu.memory_space<smem>>
    %51 = vector.broadcast %48 : f32 to vector<8x128xf32>
    %52 = arith.mulf %7, %51 : vector<8x128xf32>
    %53 = vector.broadcast %49 : f32 to vector<8x128xf32>
    %54 = arith.addf %52, %53 : vector<8x128xf32>
    %cst_31 = arith.constant 0.000000e+00 : f32
    %55 = vector.broadcast %cst_31 : f32 to vector<8x128xf32>
    %56 = arith.maximumf %54, %55 : vector<8x128xf32>
    %57 = vector.broadcast %50 : f32 to vector<8x128xf32>
    %58 = arith.mulf %56, %57 : vector<8x128xf32>
    %59 = arith.addf %11, %58 : vector<8x128xf32>
    %c0_32 = arith.constant 0 : index
    %c4 = arith.constant 4 : index
    %60 = memref.load %arg1[%c0_32, %c4] : memref<4x32xf32, #tpu.memory_space<smem>>
    %c1_33 = arith.constant 1 : index
    %c4_34 = arith.constant 4 : index
    %61 = memref.load %arg1[%c1_33, %c4_34] : memref<4x32xf32, #tpu.memory_space<smem>>
    %c2_35 = arith.constant 2 : index
    %c4_36 = arith.constant 4 : index
    %62 = memref.load %arg1[%c2_35, %c4_36] : memref<4x32xf32, #tpu.memory_space<smem>>
    %63 = vector.broadcast %60 : f32 to vector<8x128xf32>
    %64 = arith.mulf %7, %63 : vector<8x128xf32>
    %65 = vector.broadcast %61 : f32 to vector<8x128xf32>
    %66 = arith.addf %64, %65 : vector<8x128xf32>
    %cst_37 = arith.constant 0.000000e+00 : f32
    %67 = vector.broadcast %cst_37 : f32 to vector<8x128xf32>
    %68 = arith.maximumf %66, %67 : vector<8x128xf32>
    %69 = vector.broadcast %62 : f32 to vector<8x128xf32>
    %70 = arith.mulf %68, %69 : vector<8x128xf32>
    %71 = arith.addf %23, %70 : vector<8x128xf32>
    %c0_38 = arith.constant 0 : index
    %c5 = arith.constant 5 : index
    %72 = memref.load %arg1[%c0_38, %c5] : memref<4x32xf32, #tpu.memory_space<smem>>
    %c1_39 = arith.constant 1 : index
    %c5_40 = arith.constant 5 : index
    %73 = memref.load %arg1[%c1_39, %c5_40] : memref<4x32xf32, #tpu.memory_space<smem>>
    %c2_41 = arith.constant 2 : index
    %c5_42 = arith.constant 5 : index
    %74 = memref.load %arg1[%c2_41, %c5_42] : memref<4x32xf32, #tpu.memory_space<smem>>
    %75 = vector.broadcast %72 : f32 to vector<8x128xf32>
    %76 = arith.mulf %7, %75 : vector<8x128xf32>
    %77 = vector.broadcast %73 : f32 to vector<8x128xf32>
    %78 = arith.addf %76, %77 : vector<8x128xf32>
    %cst_43 = arith.constant 0.000000e+00 : f32
    %79 = vector.broadcast %cst_43 : f32 to vector<8x128xf32>
    %80 = arith.maximumf %78, %79 : vector<8x128xf32>
    %81 = vector.broadcast %74 : f32 to vector<8x128xf32>
    %82 = arith.mulf %80, %81 : vector<8x128xf32>
    %83 = arith.addf %35, %82 : vector<8x128xf32>
    %c0_44 = arith.constant 0 : index
    %c6 = arith.constant 6 : index
    %84 = memref.load %arg1[%c0_44, %c6] : memref<4x32xf32, #tpu.memory_space<smem>>
    %c1_45 = arith.constant 1 : index
    %c6_46 = arith.constant 6 : index
    %85 = memref.load %arg1[%c1_45, %c6_46] : memref<4x32xf32, #tpu.memory_space<smem>>
    %c2_47 = arith.constant 2 : index
    %c6_48 = arith.constant 6 : index
    %86 = memref.load %arg1[%c2_47, %c6_48] : memref<4x32xf32, #tpu.memory_space<smem>>
    %87 = vector.broadcast %84 : f32 to vector<8x128xf32>
    %88 = arith.mulf %7, %87 : vector<8x128xf32>
    %89 = vector.broadcast %85 : f32 to vector<8x128xf32>
    %90 = arith.addf %88, %89 : vector<8x128xf32>
    %cst_49 = arith.constant 0.000000e+00 : f32
    %91 = vector.broadcast %cst_49 : f32 to vector<8x128xf32>
    %92 = arith.maximumf %90, %91 : vector<8x128xf32>
    %93 = vector.broadcast %86 : f32 to vector<8x128xf32>
    %94 = arith.mulf %92, %93 : vector<8x128xf32>
    %95 = arith.addf %47, %94 : vector<8x128xf32>
    %c0_50 = arith.constant 0 : index
    %c7 = arith.constant 7 : index
    %96 = memref.load %arg1[%c0_50, %c7] : memref<4x32xf32, #tpu.memory_space<smem>>
    %c1_51 = arith.constant 1 : index
    %c7_52 = arith.constant 7 : index
    %97 = memref.load %arg1[%c1_51, %c7_52] : memref<4x32xf32, #tpu.memory_space<smem>>
    %c2_53 = arith.constant 2 : index
    %c7_54 = arith.constant 7 : index
    %98 = memref.load %arg1[%c2_53, %c7_54] : memref<4x32xf32, #tpu.memory_space<smem>>
    %99 = vector.broadcast %96 : f32 to vector<8x128xf32>
    %100 = arith.mulf %7, %99 : vector<8x128xf32>
    %101 = vector.broadcast %97 : f32 to vector<8x128xf32>
    %102 = arith.addf %100, %101 : vector<8x128xf32>
    %cst_55 = arith.constant 0.000000e+00 : f32
    %103 = vector.broadcast %cst_55 : f32 to vector<8x128xf32>
    %104 = arith.maximumf %102, %103 : vector<8x128xf32>
    %105 = vector.broadcast %98 : f32 to vector<8x128xf32>
    %106 = arith.mulf %104, %105 : vector<8x128xf32>
    %107 = arith.addf %59, %106 : vector<8x128xf32>
    %c0_56 = arith.constant 0 : index
    %c8 = arith.constant 8 : index
    %108 = memref.load %arg1[%c0_56, %c8] : memref<4x32xf32, #tpu.memory_space<smem>>
    %c1_57 = arith.constant 1 : index
    %c8_58 = arith.constant 8 : index
    %109 = memref.load %arg1[%c1_57, %c8_58] : memref<4x32xf32, #tpu.memory_space<smem>>
    %c2_59 = arith.constant 2 : index
    %c8_60 = arith.constant 8 : index
    %110 = memref.load %arg1[%c2_59, %c8_60] : memref<4x32xf32, #tpu.memory_space<smem>>
    %111 = vector.broadcast %108 : f32 to vector<8x128xf32>
    %112 = arith.mulf %7, %111 : vector<8x128xf32>
    %113 = vector.broadcast %109 : f32 to vector<8x128xf32>
    %114 = arith.addf %112, %113 : vector<8x128xf32>
    %cst_61 = arith.constant 0.000000e+00 : f32
    %115 = vector.broadcast %cst_61 : f32 to vector<8x128xf32>
    %116 = arith.maximumf %114, %115 : vector<8x128xf32>
    %117 = vector.broadcast %110 : f32 to vector<8x128xf32>
    %118 = arith.mulf %116, %117 : vector<8x128xf32>
    %119 = arith.addf %71, %118 : vector<8x128xf32>
    %c0_62 = arith.constant 0 : index
    %c9 = arith.constant 9 : index
    %120 = memref.load %arg1[%c0_62, %c9] : memref<4x32xf32, #tpu.memory_space<smem>>
    %c1_63 = arith.constant 1 : index
    %c9_64 = arith.constant 9 : index
    %121 = memref.load %arg1[%c1_63, %c9_64] : memref<4x32xf32, #tpu.memory_space<smem>>
    %c2_65 = arith.constant 2 : index
    %c9_66 = arith.constant 9 : index
    %122 = memref.load %arg1[%c2_65, %c9_66] : memref<4x32xf32, #tpu.memory_space<smem>>
    %123 = vector.broadcast %120 : f32 to vector<8x128xf32>
    %124 = arith.mulf %7, %123 : vector<8x128xf32>
    %125 = vector.broadcast %121 : f32 to vector<8x128xf32>
    %126 = arith.addf %124, %125 : vector<8x128xf32>
    %cst_67 = arith.constant 0.000000e+00 : f32
    %127 = vector.broadcast %cst_67 : f32 to vector<8x128xf32>
    %128 = arith.maximumf %126, %127 : vector<8x128xf32>
    %129 = vector.broadcast %122 : f32 to vector<8x128xf32>
    %130 = arith.mulf %128, %129 : vector<8x128xf32>
    %131 = arith.addf %83, %130 : vector<8x128xf32>
    %c0_68 = arith.constant 0 : index
    %c10 = arith.constant 10 : index
    %132 = memref.load %arg1[%c0_68, %c10] : memref<4x32xf32, #tpu.memory_space<smem>>
    %c1_69 = arith.constant 1 : index
    %c10_70 = arith.constant 10 : index
    %133 = memref.load %arg1[%c1_69, %c10_70] : memref<4x32xf32, #tpu.memory_space<smem>>
    %c2_71 = arith.constant 2 : index
    %c10_72 = arith.constant 10 : index
    %134 = memref.load %arg1[%c2_71, %c10_72] : memref<4x32xf32, #tpu.memory_space<smem>>
    %135 = vector.broadcast %132 : f32 to vector<8x128xf32>
    %136 = arith.mulf %7, %135 : vector<8x128xf32>
    %137 = vector.broadcast %133 : f32 to vector<8x128xf32>
    %138 = arith.addf %136, %137 : vector<8x128xf32>
    %cst_73 = arith.constant 0.000000e+00 : f32
    %139 = vector.broadcast %cst_73 : f32 to vector<8x128xf32>
    %140 = arith.maximumf %138, %139 : vector<8x128xf32>
    %141 = vector.broadcast %134 : f32 to vector<8x128xf32>
    %142 = arith.mulf %140, %141 : vector<8x128xf32>
    %143 = arith.addf %95, %142 : vector<8x128xf32>
    %c0_74 = arith.constant 0 : index
    %c11 = arith.constant 11 : index
    %144 = memref.load %arg1[%c0_74, %c11] : memref<4x32xf32, #tpu.memory_space<smem>>
    %c1_75 = arith.constant 1 : index
    %c11_76 = arith.constant 11 : index
    %145 = memref.load %arg1[%c1_75, %c11_76] : memref<4x32xf32, #tpu.memory_space<smem>>
    %c2_77 = arith.constant 2 : index
    %c11_78 = arith.constant 11 : index
    %146 = memref.load %arg1[%c2_77, %c11_78] : memref<4x32xf32, #tpu.memory_space<smem>>
    %147 = vector.broadcast %144 : f32 to vector<8x128xf32>
    %148 = arith.mulf %7, %147 : vector<8x128xf32>
    %149 = vector.broadcast %145 : f32 to vector<8x128xf32>
    %150 = arith.addf %148, %149 : vector<8x128xf32>
    %cst_79 = arith.constant 0.000000e+00 : f32
    %151 = vector.broadcast %cst_79 : f32 to vector<8x128xf32>
    %152 = arith.maximumf %150, %151 : vector<8x128xf32>
    %153 = vector.broadcast %146 : f32 to vector<8x128xf32>
    %154 = arith.mulf %152, %153 : vector<8x128xf32>
    %155 = arith.addf %107, %154 : vector<8x128xf32>
    %c0_80 = arith.constant 0 : index
    %c12 = arith.constant 12 : index
    %156 = memref.load %arg1[%c0_80, %c12] : memref<4x32xf32, #tpu.memory_space<smem>>
    %c1_81 = arith.constant 1 : index
    %c12_82 = arith.constant 12 : index
    %157 = memref.load %arg1[%c1_81, %c12_82] : memref<4x32xf32, #tpu.memory_space<smem>>
    %c2_83 = arith.constant 2 : index
    %c12_84 = arith.constant 12 : index
    %158 = memref.load %arg1[%c2_83, %c12_84] : memref<4x32xf32, #tpu.memory_space<smem>>
    %159 = vector.broadcast %156 : f32 to vector<8x128xf32>
    %160 = arith.mulf %7, %159 : vector<8x128xf32>
    %161 = vector.broadcast %157 : f32 to vector<8x128xf32>
    %162 = arith.addf %160, %161 : vector<8x128xf32>
    %cst_85 = arith.constant 0.000000e+00 : f32
    %163 = vector.broadcast %cst_85 : f32 to vector<8x128xf32>
    %164 = arith.maximumf %162, %163 : vector<8x128xf32>
    %165 = vector.broadcast %158 : f32 to vector<8x128xf32>
    %166 = arith.mulf %164, %165 : vector<8x128xf32>
    %167 = arith.addf %119, %166 : vector<8x128xf32>
    %c0_86 = arith.constant 0 : index
    %c13 = arith.constant 13 : index
    %168 = memref.load %arg1[%c0_86, %c13] : memref<4x32xf32, #tpu.memory_space<smem>>
    %c1_87 = arith.constant 1 : index
    %c13_88 = arith.constant 13 : index
    %169 = memref.load %arg1[%c1_87, %c13_88] : memref<4x32xf32, #tpu.memory_space<smem>>
    %c2_89 = arith.constant 2 : index
    %c13_90 = arith.constant 13 : index
    %170 = memref.load %arg1[%c2_89, %c13_90] : memref<4x32xf32, #tpu.memory_space<smem>>
    %171 = vector.broadcast %168 : f32 to vector<8x128xf32>
    %172 = arith.mulf %7, %171 : vector<8x128xf32>
    %173 = vector.broadcast %169 : f32 to vector<8x128xf32>
    %174 = arith.addf %172, %173 : vector<8x128xf32>
    %cst_91 = arith.constant 0.000000e+00 : f32
    %175 = vector.broadcast %cst_91 : f32 to vector<8x128xf32>
    %176 = arith.maximumf %174, %175 : vector<8x128xf32>
    %177 = vector.broadcast %170 : f32 to vector<8x128xf32>
    %178 = arith.mulf %176, %177 : vector<8x128xf32>
    %179 = arith.addf %131, %178 : vector<8x128xf32>
    %c0_92 = arith.constant 0 : index
    %c14 = arith.constant 14 : index
    %180 = memref.load %arg1[%c0_92, %c14] : memref<4x32xf32, #tpu.memory_space<smem>>
    %c1_93 = arith.constant 1 : index
    %c14_94 = arith.constant 14 : index
    %181 = memref.load %arg1[%c1_93, %c14_94] : memref<4x32xf32, #tpu.memory_space<smem>>
    %c2_95 = arith.constant 2 : index
    %c14_96 = arith.constant 14 : index
    %182 = memref.load %arg1[%c2_95, %c14_96] : memref<4x32xf32, #tpu.memory_space<smem>>
    %183 = vector.broadcast %180 : f32 to vector<8x128xf32>
    %184 = arith.mulf %7, %183 : vector<8x128xf32>
    %185 = vector.broadcast %181 : f32 to vector<8x128xf32>
    %186 = arith.addf %184, %185 : vector<8x128xf32>
    %cst_97 = arith.constant 0.000000e+00 : f32
    %187 = vector.broadcast %cst_97 : f32 to vector<8x128xf32>
    %188 = arith.maximumf %186, %187 : vector<8x128xf32>
    %189 = vector.broadcast %182 : f32 to vector<8x128xf32>
    %190 = arith.mulf %188, %189 : vector<8x128xf32>
    %191 = arith.addf %143, %190 : vector<8x128xf32>
    %c0_98 = arith.constant 0 : index
    %c15 = arith.constant 15 : index
    %192 = memref.load %arg1[%c0_98, %c15] : memref<4x32xf32, #tpu.memory_space<smem>>
    %c1_99 = arith.constant 1 : index
    %c15_100 = arith.constant 15 : index
    %193 = memref.load %arg1[%c1_99, %c15_100] : memref<4x32xf32, #tpu.memory_space<smem>>
    %c2_101 = arith.constant 2 : index
    %c15_102 = arith.constant 15 : index
    %194 = memref.load %arg1[%c2_101, %c15_102] : memref<4x32xf32, #tpu.memory_space<smem>>
    %195 = vector.broadcast %192 : f32 to vector<8x128xf32>
    %196 = arith.mulf %7, %195 : vector<8x128xf32>
    %197 = vector.broadcast %193 : f32 to vector<8x128xf32>
    %198 = arith.addf %196, %197 : vector<8x128xf32>
    %cst_103 = arith.constant 0.000000e+00 : f32
    %199 = vector.broadcast %cst_103 : f32 to vector<8x128xf32>
    %200 = arith.maximumf %198, %199 : vector<8x128xf32>
    %201 = vector.broadcast %194 : f32 to vector<8x128xf32>
    %202 = arith.mulf %200, %201 : vector<8x128xf32>
    %203 = arith.addf %155, %202 : vector<8x128xf32>
    %c0_104 = arith.constant 0 : index
    %c16 = arith.constant 16 : index
    %204 = memref.load %arg1[%c0_104, %c16] : memref<4x32xf32, #tpu.memory_space<smem>>
    %c1_105 = arith.constant 1 : index
    %c16_106 = arith.constant 16 : index
    %205 = memref.load %arg1[%c1_105, %c16_106] : memref<4x32xf32, #tpu.memory_space<smem>>
    %c2_107 = arith.constant 2 : index
    %c16_108 = arith.constant 16 : index
    %206 = memref.load %arg1[%c2_107, %c16_108] : memref<4x32xf32, #tpu.memory_space<smem>>
    %207 = vector.broadcast %204 : f32 to vector<8x128xf32>
    %208 = arith.mulf %7, %207 : vector<8x128xf32>
    %209 = vector.broadcast %205 : f32 to vector<8x128xf32>
    %210 = arith.addf %208, %209 : vector<8x128xf32>
    %cst_109 = arith.constant 0.000000e+00 : f32
    %211 = vector.broadcast %cst_109 : f32 to vector<8x128xf32>
    %212 = arith.maximumf %210, %211 : vector<8x128xf32>
    %213 = vector.broadcast %206 : f32 to vector<8x128xf32>
    %214 = arith.mulf %212, %213 : vector<8x128xf32>
    %215 = arith.addf %167, %214 : vector<8x128xf32>
    %c0_110 = arith.constant 0 : index
    %c17 = arith.constant 17 : index
    %216 = memref.load %arg1[%c0_110, %c17] : memref<4x32xf32, #tpu.memory_space<smem>>
    %c1_111 = arith.constant 1 : index
    %c17_112 = arith.constant 17 : index
    %217 = memref.load %arg1[%c1_111, %c17_112] : memref<4x32xf32, #tpu.memory_space<smem>>
    %c2_113 = arith.constant 2 : index
    %c17_114 = arith.constant 17 : index
    %218 = memref.load %arg1[%c2_113, %c17_114] : memref<4x32xf32, #tpu.memory_space<smem>>
    %219 = vector.broadcast %216 : f32 to vector<8x128xf32>
    %220 = arith.mulf %7, %219 : vector<8x128xf32>
    %221 = vector.broadcast %217 : f32 to vector<8x128xf32>
    %222 = arith.addf %220, %221 : vector<8x128xf32>
    %cst_115 = arith.constant 0.000000e+00 : f32
    %223 = vector.broadcast %cst_115 : f32 to vector<8x128xf32>
    %224 = arith.maximumf %222, %223 : vector<8x128xf32>
    %225 = vector.broadcast %218 : f32 to vector<8x128xf32>
    %226 = arith.mulf %224, %225 : vector<8x128xf32>
    %227 = arith.addf %179, %226 : vector<8x128xf32>
    %c0_116 = arith.constant 0 : index
    %c18 = arith.constant 18 : index
    %228 = memref.load %arg1[%c0_116, %c18] : memref<4x32xf32, #tpu.memory_space<smem>>
    %c1_117 = arith.constant 1 : index
    %c18_118 = arith.constant 18 : index
    %229 = memref.load %arg1[%c1_117, %c18_118] : memref<4x32xf32, #tpu.memory_space<smem>>
    %c2_119 = arith.constant 2 : index
    %c18_120 = arith.constant 18 : index
    %230 = memref.load %arg1[%c2_119, %c18_120] : memref<4x32xf32, #tpu.memory_space<smem>>
    %231 = vector.broadcast %228 : f32 to vector<8x128xf32>
    %232 = arith.mulf %7, %231 : vector<8x128xf32>
    %233 = vector.broadcast %229 : f32 to vector<8x128xf32>
    %234 = arith.addf %232, %233 : vector<8x128xf32>
    %cst_121 = arith.constant 0.000000e+00 : f32
    %235 = vector.broadcast %cst_121 : f32 to vector<8x128xf32>
    %236 = arith.maximumf %234, %235 : vector<8x128xf32>
    %237 = vector.broadcast %230 : f32 to vector<8x128xf32>
    %238 = arith.mulf %236, %237 : vector<8x128xf32>
    %239 = arith.addf %191, %238 : vector<8x128xf32>
    %c0_122 = arith.constant 0 : index
    %c19 = arith.constant 19 : index
    %240 = memref.load %arg1[%c0_122, %c19] : memref<4x32xf32, #tpu.memory_space<smem>>
    %c1_123 = arith.constant 1 : index
    %c19_124 = arith.constant 19 : index
    %241 = memref.load %arg1[%c1_123, %c19_124] : memref<4x32xf32, #tpu.memory_space<smem>>
    %c2_125 = arith.constant 2 : index
    %c19_126 = arith.constant 19 : index
    %242 = memref.load %arg1[%c2_125, %c19_126] : memref<4x32xf32, #tpu.memory_space<smem>>
    %243 = vector.broadcast %240 : f32 to vector<8x128xf32>
    %244 = arith.mulf %7, %243 : vector<8x128xf32>
    %245 = vector.broadcast %241 : f32 to vector<8x128xf32>
    %246 = arith.addf %244, %245 : vector<8x128xf32>
    %cst_127 = arith.constant 0.000000e+00 : f32
    %247 = vector.broadcast %cst_127 : f32 to vector<8x128xf32>
    %248 = arith.maximumf %246, %247 : vector<8x128xf32>
    %249 = vector.broadcast %242 : f32 to vector<8x128xf32>
    %250 = arith.mulf %248, %249 : vector<8x128xf32>
    %251 = arith.addf %203, %250 : vector<8x128xf32>
    %c0_128 = arith.constant 0 : index
    %c20 = arith.constant 20 : index
    %252 = memref.load %arg1[%c0_128, %c20] : memref<4x32xf32, #tpu.memory_space<smem>>
    %c1_129 = arith.constant 1 : index
    %c20_130 = arith.constant 20 : index
    %253 = memref.load %arg1[%c1_129, %c20_130] : memref<4x32xf32, #tpu.memory_space<smem>>
    %c2_131 = arith.constant 2 : index
    %c20_132 = arith.constant 20 : index
    %254 = memref.load %arg1[%c2_131, %c20_132] : memref<4x32xf32, #tpu.memory_space<smem>>
    %255 = vector.broadcast %252 : f32 to vector<8x128xf32>
    %256 = arith.mulf %7, %255 : vector<8x128xf32>
    %257 = vector.broadcast %253 : f32 to vector<8x128xf32>
    %258 = arith.addf %256, %257 : vector<8x128xf32>
    %cst_133 = arith.constant 0.000000e+00 : f32
    %259 = vector.broadcast %cst_133 : f32 to vector<8x128xf32>
    %260 = arith.maximumf %258, %259 : vector<8x128xf32>
    %261 = vector.broadcast %254 : f32 to vector<8x128xf32>
    %262 = arith.mulf %260, %261 : vector<8x128xf32>
    %263 = arith.addf %215, %262 : vector<8x128xf32>
    %c0_134 = arith.constant 0 : index
    %c21 = arith.constant 21 : index
    %264 = memref.load %arg1[%c0_134, %c21] : memref<4x32xf32, #tpu.memory_space<smem>>
    %c1_135 = arith.constant 1 : index
    %c21_136 = arith.constant 21 : index
    %265 = memref.load %arg1[%c1_135, %c21_136] : memref<4x32xf32, #tpu.memory_space<smem>>
    %c2_137 = arith.constant 2 : index
    %c21_138 = arith.constant 21 : index
    %266 = memref.load %arg1[%c2_137, %c21_138] : memref<4x32xf32, #tpu.memory_space<smem>>
    %267 = vector.broadcast %264 : f32 to vector<8x128xf32>
    %268 = arith.mulf %7, %267 : vector<8x128xf32>
    %269 = vector.broadcast %265 : f32 to vector<8x128xf32>
    %270 = arith.addf %268, %269 : vector<8x128xf32>
    %cst_139 = arith.constant 0.000000e+00 : f32
    %271 = vector.broadcast %cst_139 : f32 to vector<8x128xf32>
    %272 = arith.maximumf %270, %271 : vector<8x128xf32>
    %273 = vector.broadcast %266 : f32 to vector<8x128xf32>
    %274 = arith.mulf %272, %273 : vector<8x128xf32>
    %275 = arith.addf %227, %274 : vector<8x128xf32>
    %c0_140 = arith.constant 0 : index
    %c22 = arith.constant 22 : index
    %276 = memref.load %arg1[%c0_140, %c22] : memref<4x32xf32, #tpu.memory_space<smem>>
    %c1_141 = arith.constant 1 : index
    %c22_142 = arith.constant 22 : index
    %277 = memref.load %arg1[%c1_141, %c22_142] : memref<4x32xf32, #tpu.memory_space<smem>>
    %c2_143 = arith.constant 2 : index
    %c22_144 = arith.constant 22 : index
    %278 = memref.load %arg1[%c2_143, %c22_144] : memref<4x32xf32, #tpu.memory_space<smem>>
    %279 = vector.broadcast %276 : f32 to vector<8x128xf32>
    %280 = arith.mulf %7, %279 : vector<8x128xf32>
    %281 = vector.broadcast %277 : f32 to vector<8x128xf32>
    %282 = arith.addf %280, %281 : vector<8x128xf32>
    %cst_145 = arith.constant 0.000000e+00 : f32
    %283 = vector.broadcast %cst_145 : f32 to vector<8x128xf32>
    %284 = arith.maximumf %282, %283 : vector<8x128xf32>
    %285 = vector.broadcast %278 : f32 to vector<8x128xf32>
    %286 = arith.mulf %284, %285 : vector<8x128xf32>
    %287 = arith.addf %239, %286 : vector<8x128xf32>
    %c0_146 = arith.constant 0 : index
    %c23 = arith.constant 23 : index
    %288 = memref.load %arg1[%c0_146, %c23] : memref<4x32xf32, #tpu.memory_space<smem>>
    %c1_147 = arith.constant 1 : index
    %c23_148 = arith.constant 23 : index
    %289 = memref.load %arg1[%c1_147, %c23_148] : memref<4x32xf32, #tpu.memory_space<smem>>
    %c2_149 = arith.constant 2 : index
    %c23_150 = arith.constant 23 : index
    %290 = memref.load %arg1[%c2_149, %c23_150] : memref<4x32xf32, #tpu.memory_space<smem>>
    %291 = vector.broadcast %288 : f32 to vector<8x128xf32>
    %292 = arith.mulf %7, %291 : vector<8x128xf32>
    %293 = vector.broadcast %289 : f32 to vector<8x128xf32>
    %294 = arith.addf %292, %293 : vector<8x128xf32>
    %cst_151 = arith.constant 0.000000e+00 : f32
    %295 = vector.broadcast %cst_151 : f32 to vector<8x128xf32>
    %296 = arith.maximumf %294, %295 : vector<8x128xf32>
    %297 = vector.broadcast %290 : f32 to vector<8x128xf32>
    %298 = arith.mulf %296, %297 : vector<8x128xf32>
    %299 = arith.addf %251, %298 : vector<8x128xf32>
    %c0_152 = arith.constant 0 : index
    %c24 = arith.constant 24 : index
    %300 = memref.load %arg1[%c0_152, %c24] : memref<4x32xf32, #tpu.memory_space<smem>>
    %c1_153 = arith.constant 1 : index
    %c24_154 = arith.constant 24 : index
    %301 = memref.load %arg1[%c1_153, %c24_154] : memref<4x32xf32, #tpu.memory_space<smem>>
    %c2_155 = arith.constant 2 : index
    %c24_156 = arith.constant 24 : index
    %302 = memref.load %arg1[%c2_155, %c24_156] : memref<4x32xf32, #tpu.memory_space<smem>>
    %303 = vector.broadcast %300 : f32 to vector<8x128xf32>
    %304 = arith.mulf %7, %303 : vector<8x128xf32>
    %305 = vector.broadcast %301 : f32 to vector<8x128xf32>
    %306 = arith.addf %304, %305 : vector<8x128xf32>
    %cst_157 = arith.constant 0.000000e+00 : f32
    %307 = vector.broadcast %cst_157 : f32 to vector<8x128xf32>
    %308 = arith.maximumf %306, %307 : vector<8x128xf32>
    %309 = vector.broadcast %302 : f32 to vector<8x128xf32>
    %310 = arith.mulf %308, %309 : vector<8x128xf32>
    %311 = arith.addf %263, %310 : vector<8x128xf32>
    %c0_158 = arith.constant 0 : index
    %c25 = arith.constant 25 : index
    %312 = memref.load %arg1[%c0_158, %c25] : memref<4x32xf32, #tpu.memory_space<smem>>
    %c1_159 = arith.constant 1 : index
    %c25_160 = arith.constant 25 : index
    %313 = memref.load %arg1[%c1_159, %c25_160] : memref<4x32xf32, #tpu.memory_space<smem>>
    %c2_161 = arith.constant 2 : index
    %c25_162 = arith.constant 25 : index
    %314 = memref.load %arg1[%c2_161, %c25_162] : memref<4x32xf32, #tpu.memory_space<smem>>
    %315 = vector.broadcast %312 : f32 to vector<8x128xf32>
    %316 = arith.mulf %7, %315 : vector<8x128xf32>
    %317 = vector.broadcast %313 : f32 to vector<8x128xf32>
    %318 = arith.addf %316, %317 : vector<8x128xf32>
    %cst_163 = arith.constant 0.000000e+00 : f32
    %319 = vector.broadcast %cst_163 : f32 to vector<8x128xf32>
    %320 = arith.maximumf %318, %319 : vector<8x128xf32>
    %321 = vector.broadcast %314 : f32 to vector<8x128xf32>
    %322 = arith.mulf %320, %321 : vector<8x128xf32>
    %323 = arith.addf %275, %322 : vector<8x128xf32>
    %c0_164 = arith.constant 0 : index
    %c26 = arith.constant 26 : index
    %324 = memref.load %arg1[%c0_164, %c26] : memref<4x32xf32, #tpu.memory_space<smem>>
    %c1_165 = arith.constant 1 : index
    %c26_166 = arith.constant 26 : index
    %325 = memref.load %arg1[%c1_165, %c26_166] : memref<4x32xf32, #tpu.memory_space<smem>>
    %c2_167 = arith.constant 2 : index
    %c26_168 = arith.constant 26 : index
    %326 = memref.load %arg1[%c2_167, %c26_168] : memref<4x32xf32, #tpu.memory_space<smem>>
    %327 = vector.broadcast %324 : f32 to vector<8x128xf32>
    %328 = arith.mulf %7, %327 : vector<8x128xf32>
    %329 = vector.broadcast %325 : f32 to vector<8x128xf32>
    %330 = arith.addf %328, %329 : vector<8x128xf32>
    %cst_169 = arith.constant 0.000000e+00 : f32
    %331 = vector.broadcast %cst_169 : f32 to vector<8x128xf32>
    %332 = arith.maximumf %330, %331 : vector<8x128xf32>
    %333 = vector.broadcast %326 : f32 to vector<8x128xf32>
    %334 = arith.mulf %332, %333 : vector<8x128xf32>
    %335 = arith.addf %287, %334 : vector<8x128xf32>
    %c0_170 = arith.constant 0 : index
    %c27 = arith.constant 27 : index
    %336 = memref.load %arg1[%c0_170, %c27] : memref<4x32xf32, #tpu.memory_space<smem>>
    %c1_171 = arith.constant 1 : index
    %c27_172 = arith.constant 27 : index
    %337 = memref.load %arg1[%c1_171, %c27_172] : memref<4x32xf32, #tpu.memory_space<smem>>
    %c2_173 = arith.constant 2 : index
    %c27_174 = arith.constant 27 : index
    %338 = memref.load %arg1[%c2_173, %c27_174] : memref<4x32xf32, #tpu.memory_space<smem>>
    %339 = vector.broadcast %336 : f32 to vector<8x128xf32>
    %340 = arith.mulf %7, %339 : vector<8x128xf32>
    %341 = vector.broadcast %337 : f32 to vector<8x128xf32>
    %342 = arith.addf %340, %341 : vector<8x128xf32>
    %cst_175 = arith.constant 0.000000e+00 : f32
    %343 = vector.broadcast %cst_175 : f32 to vector<8x128xf32>
    %344 = arith.maximumf %342, %343 : vector<8x128xf32>
    %345 = vector.broadcast %338 : f32 to vector<8x128xf32>
    %346 = arith.mulf %344, %345 : vector<8x128xf32>
    %347 = arith.addf %299, %346 : vector<8x128xf32>
    %c0_176 = arith.constant 0 : index
    %c28 = arith.constant 28 : index
    %348 = memref.load %arg1[%c0_176, %c28] : memref<4x32xf32, #tpu.memory_space<smem>>
    %c1_177 = arith.constant 1 : index
    %c28_178 = arith.constant 28 : index
    %349 = memref.load %arg1[%c1_177, %c28_178] : memref<4x32xf32, #tpu.memory_space<smem>>
    %c2_179 = arith.constant 2 : index
    %c28_180 = arith.constant 28 : index
    %350 = memref.load %arg1[%c2_179, %c28_180] : memref<4x32xf32, #tpu.memory_space<smem>>
    %351 = vector.broadcast %348 : f32 to vector<8x128xf32>
    %352 = arith.mulf %7, %351 : vector<8x128xf32>
    %353 = vector.broadcast %349 : f32 to vector<8x128xf32>
    %354 = arith.addf %352, %353 : vector<8x128xf32>
    %cst_181 = arith.constant 0.000000e+00 : f32
    %355 = vector.broadcast %cst_181 : f32 to vector<8x128xf32>
    %356 = arith.maximumf %354, %355 : vector<8x128xf32>
    %357 = vector.broadcast %350 : f32 to vector<8x128xf32>
    %358 = arith.mulf %356, %357 : vector<8x128xf32>
    %359 = arith.addf %311, %358 : vector<8x128xf32>
    %c0_182 = arith.constant 0 : index
    %c29 = arith.constant 29 : index
    %360 = memref.load %arg1[%c0_182, %c29] : memref<4x32xf32, #tpu.memory_space<smem>>
    %c1_183 = arith.constant 1 : index
    %c29_184 = arith.constant 29 : index
    %361 = memref.load %arg1[%c1_183, %c29_184] : memref<4x32xf32, #tpu.memory_space<smem>>
    %c2_185 = arith.constant 2 : index
    %c29_186 = arith.constant 29 : index
    %362 = memref.load %arg1[%c2_185, %c29_186] : memref<4x32xf32, #tpu.memory_space<smem>>
    %363 = vector.broadcast %360 : f32 to vector<8x128xf32>
    %364 = arith.mulf %7, %363 : vector<8x128xf32>
    %365 = vector.broadcast %361 : f32 to vector<8x128xf32>
    %366 = arith.addf %364, %365 : vector<8x128xf32>
    %cst_187 = arith.constant 0.000000e+00 : f32
    %367 = vector.broadcast %cst_187 : f32 to vector<8x128xf32>
    %368 = arith.maximumf %366, %367 : vector<8x128xf32>
    %369 = vector.broadcast %362 : f32 to vector<8x128xf32>
    %370 = arith.mulf %368, %369 : vector<8x128xf32>
    %371 = arith.addf %323, %370 : vector<8x128xf32>
    %c0_188 = arith.constant 0 : index
    %c30 = arith.constant 30 : index
    %372 = memref.load %arg1[%c0_188, %c30] : memref<4x32xf32, #tpu.memory_space<smem>>
    %c1_189 = arith.constant 1 : index
    %c30_190 = arith.constant 30 : index
    %373 = memref.load %arg1[%c1_189, %c30_190] : memref<4x32xf32, #tpu.memory_space<smem>>
    %c2_191 = arith.constant 2 : index
    %c30_192 = arith.constant 30 : index
    %374 = memref.load %arg1[%c2_191, %c30_192] : memref<4x32xf32, #tpu.memory_space<smem>>
    %375 = vector.broadcast %372 : f32 to vector<8x128xf32>
    %376 = arith.mulf %7, %375 : vector<8x128xf32>
    %377 = vector.broadcast %373 : f32 to vector<8x128xf32>
    %378 = arith.addf %376, %377 : vector<8x128xf32>
    %cst_193 = arith.constant 0.000000e+00 : f32
    %379 = vector.broadcast %cst_193 : f32 to vector<8x128xf32>
    %380 = arith.maximumf %378, %379 : vector<8x128xf32>
    %381 = vector.broadcast %374 : f32 to vector<8x128xf32>
    %382 = arith.mulf %380, %381 : vector<8x128xf32>
    %383 = arith.addf %335, %382 : vector<8x128xf32>
    %c0_194 = arith.constant 0 : index
    %c31 = arith.constant 31 : index
    %384 = memref.load %arg1[%c0_194, %c31] : memref<4x32xf32, #tpu.memory_space<smem>>
    %c1_195 = arith.constant 1 : index
    %c31_196 = arith.constant 31 : index
    %385 = memref.load %arg1[%c1_195, %c31_196] : memref<4x32xf32, #tpu.memory_space<smem>>
    %c2_197 = arith.constant 2 : index
    %c31_198 = arith.constant 31 : index
    %386 = memref.load %arg1[%c2_197, %c31_198] : memref<4x32xf32, #tpu.memory_space<smem>>
    %387 = vector.broadcast %384 : f32 to vector<8x128xf32>
    %388 = arith.mulf %7, %387 : vector<8x128xf32>
    %389 = vector.broadcast %385 : f32 to vector<8x128xf32>
    %390 = arith.addf %388, %389 : vector<8x128xf32>
    %cst_199 = arith.constant 0.000000e+00 : f32
    %391 = vector.broadcast %cst_199 : f32 to vector<8x128xf32>
    %392 = arith.maximumf %390, %391 : vector<8x128xf32>
    %393 = vector.broadcast %386 : f32 to vector<8x128xf32>
    %394 = arith.mulf %392, %393 : vector<8x128xf32>
    %395 = arith.addf %347, %394 : vector<8x128xf32>
    %396 = arith.addf %359, %371 : vector<8x128xf32>
    %397 = arith.addf %383, %395 : vector<8x128xf32>
    %398 = arith.addf %396, %397 : vector<8x128xf32>
    %cst_200 = arith.constant 5.000000e-01 : f32
    %399 = vector.broadcast %cst_200 : f32 to vector<8x128xf32>
    %400 = arith.mulf %399, %398 : vector<8x128xf32>
    %401 = math.tanh %400 : vector<8x128xf32>
    %cst_201 = arith.constant 5.000000e-01 : f32
    %402 = vector.broadcast %cst_201 : f32 to vector<8x128xf32>
    %403 = arith.mulf %402, %401 : vector<8x128xf32>
    %cst_202 = arith.constant 5.000000e-01 : f32
    %404 = vector.broadcast %cst_202 : f32 to vector<8x128xf32>
    %405 = arith.addf %403, %404 : vector<8x128xf32>
    %406 = vector.broadcast %1 : f32 to vector<8x128xf32>
    %407 = arith.cmpf ole, %7, %406 : vector<8x128xf32>
    %cst_203 = arith.constant 0.000000e+00 : f32
    %408 = vector.broadcast %cst_203 : f32 to vector<8x128xf32>
    %409 = arith.select %407, %405, %408 : vector<8x128xi1>, vector<8x128xf32>
    %410 = arith.index_cast %5 : i32 to index
    %c0_204 = arith.constant 0 : index
    %411 = vector.load %arg3[%410, %c0_204] : memref<8x128xf32, #tpu.memory_space<vmem>>, vector<8x128xf32>
    tpu.vector_store %arg3[%410, %c0_204], %409 {strides = array<i32>} : memref<8x128xf32, #tpu.memory_space<vmem>>, vector<8x128xf32>,
    %c1_i32_205 = arith.constant 1 : i32
    return
  }
  func.func @transform_0(%arg0: i32) -> (i32, i32) {
    %c0_i32 = arith.constant 0 : i32
    %c0_i32_0 = arith.constant 0 : i32
    %c0_i32_1 = arith.constant 0 : i32
    return %c0_i32, %c0_i32_0 : i32, i32
  }
  func.func @transform_1(%arg0: i32) -> (i32, i32) {
    %c0_i32 = arith.constant 0 : i32
    %c0_i32_0 = arith.constant 0 : i32
    return %arg0, %c0_i32 : i32, i32
  }
  func.func @transform_2(%arg0: i32) -> (i32, i32) {
    %c0_i32 = arith.constant 0 : i32
    %c0_i32_0 = arith.constant 0 : i32
    return %arg0, %c0_i32 : i32, i32
  }
}

</mosaic_0001>

<bundles_post_ra>
// kernel: tpu_custom_call.1
= control target key start
LH: loop header
LB: loop body
LE: loop exit
PB: predicated region body
PF: predicated region fallthrough
CT: control target
= control target key end

     0   :  { %7 = vsyncpa [#allocation5], 0  ;;  %s948_s0 = inlined_call_operand.hbm [shape: f32[4,32], index: 0, kind: input, shape index: {}]   ;;  %s949_s1 = inlined_call_operand.hbm [shape: f32[8,128], index: 1, kind: input, shape index: {}]   ;;  %s950_s2 = inlined_call_operand.hbm [shape: f32[8,128], index: 2, kind: output, shape index: {}]  }
   0x1   :  { %8 = vsyncpa [#allocation3], 0 }
   0x2   :  { %9 = vsyncpa [#allocation4], 0  ;;  %s520_s11 = scalar_lea.hbm %s948_s0, 64 }
   0x3   :  { %p521_p0 = scmp.ne.s32.totalorder %s948_s0, %s520_s11  ;;  %p524_p1 = scmp.lt.u32.totalorder %s520_s11, %s948_s0 }
   0x5   :  { %p526_p2 = pnand %p524_p1, %p521_p0 }
   0x7   :  { %529 = shalt.err (!%p526_p2)
}
   0x8   :  { %s580_s16 = smov [#allocation2]   ;;  %s581_s19 = smov [#allocation6]  }
   0x9   :  { %17 = dma.hbm_to_smem %s948_s0, 64, %s580_s16, [#allocation5]  }
   0xa   :  { %s24_s20 = sshll.u32 %s581_s19, 4  ;;  %s530_s23 = scalar_lea.hbm %s949_s1, 128  ;;  %s25_s20 = int_to_ptr.vmem [resolvable:$true] %s24_s20 }
   0xb   :  { %p531_p3 = scmp.ne.s32.totalorder %s949_s1, %s530_s23  ;;  %p534_p4 = scmp.lt.u32.totalorder %s530_s23, %s949_s1 }
   0xd   :  { %p536_p5 = pnand %p534_p4, %p531_p3 }
   0xf   :  { %539 = shalt.err (!%p536_p5)
}
  0x10   :  { %s540_s28 = scalar_lea.vmem %s25_s20, 128  ;;  %p545_p7 = scmp.lt.s32.totalorder %s25_s20, %s25_s20 }
  0x11   :  { %p541_p6 = scmp.ne.s32.totalorder %s25_s20, %s540_s28  ;;  %p546_p8 = scmp.lt.s32.totalorder %s540_s28, %s540_s28 }
  0x13   :  { %p547_p9 = por %p546_p8, %p545_p7 }
  0x15   :  { %p548_p10 = pnand %p547_p9, %p541_p6 }
  0x17   :  { %551 = shalt.err (!%p548_p10)
}
  0x18   :  { %27 = dma.hbm_to_vmem [thread:$0]  %s949_s1, 128, %s25_s20, [#allocation3]  }
  0x19   :  { %574 = dma.done.wait [#allocation5], 64  }
  0x1a   :  { %575 = vsyncadd [#allocation5], 4294967232 }
  0x1b   :  { %576 = dma.done.wait [#allocation3], 128  }
  0x1c   :  { %577 = vsyncadd [#allocation3], 4294967168 }
  0x1d   :  { %34 = sfence }
  0x1e   :  { %s622_s30 = sld [smem:[#allocation2 + $0x180]]  ;;  %s422_s6 = sld [smem:[#allocation2 + $0x1]]  ;;  %v630_v0 = vld [vmem:[#allocation6] sm:$0xff] }
  0x1f   :  { %s39_s3 = sld [smem:[#allocation2]]  ;;  %s423_s7 = sld [smem:[#allocation2 + $0x81]] }
  0x20   :  { %s420_s4 = sld [smem:[#allocation2 + $0x80]]  ;;  %s626_s8 = sld [smem:[#allocation2 + $0x101]] }
  0x21   :  { %s624_s5 = sld [smem:[#allocation2 + $0x100]]  ;;  %s425_s9 = sld [smem:[#allocation2 + $0x2]] }
  0x22   :  { %s628_s10 = sld [smem:[#allocation2 + $0x82]]  ;;  %s428_s11 = sld [smem:[#allocation2 + $0x3]] }
  0x23   :  { %s632_s1 = sld [smem:[#allocation2 + $0x102]]  ;;  %s634_s12 = sld [smem:[#allocation2 + $0x83]] }
  0x24   :  { %s636_s13 = sld [smem:[#allocation2 + $0x103]]  ;;  %s638_s14 = sld [smem:[#allocation2 + $0x4]]  ;;  %v53_v4 = vstv %s422_s6  ;;  %v38_v14 = vstv %s622_s30 }
  0x25   :  { %v42_v1 = vstv %s39_s3  ;;  %s640_s15 = sld [smem:[#allocation2 + $0x84]]  ;;  %s645_s17 = sld [smem:[#allocation2 + $0x5]]  ;;  %v54_v5 = vmul.f32 %v53_v4, %v630_v0  ;;  %v55_v6 = vstv %s423_s7 }
  0x26   :  { %v44_v2 = vstv %s420_s4  ;;  %v43_v3 = vmul.f32 %v42_v1, %v630_v0  ;;  %s643_s16 = sld [smem:[#allocation2 + $0x104]]  ;;  %s648_s18 = sld [smem:[#allocation2 + $0x85]]  ;;  %v58_v23 = vstv %s626_s8 }
  0x27   :  { %v64_v8 = vstv %s425_s9  ;;  %s651_s19 = sld [smem:[#allocation2 + $0x6]]  ;;  %v47_v10 = vstv %s624_s5  ;;  %v56_v11 = vadd.f32 %v55_v6, %v54_v5  ;;  %s657_s21 = sld [smem:[#allocation2 + $0x105]] }
  0x28   :  { %v45_v7 = vadd.f32 %v44_v2, %v43_v3  ;;  %v66_v9 = vstv %s628_s10  ;;  %s653_s20 = sld [smem:[#allocation2 + $0x86]]  ;;  %v65_v12 = vmul.f32 %v64_v8, %v630_v0  ;;  %v75_v13 = vstv %s428_s11  ;;  %s659_s22 = sld [smem:[#allocation2 + $0x7]] }
  0x29   :  { %v76_v16 = vmul.f32 %v75_v13, %v630_v0  ;;  %v77_v17 = vstv %s634_s12  ;;  %s664_s23 = sld [smem:[#allocation2 + $0x106]]  ;;  %s666_s24 = sld [smem:[#allocation2 + $0x87]]  ;;  %v57_v18 = vmax.f32 %v56_v11, 0.0  ;;  %v69_v27 = vstv %s632_s1 }
  0x2a   :  { %v46_v15 = vmax.f32 %v45_v7, 0.0  ;;  %v67_v19 = vadd.f32 %v66_v9, %v65_v12  ;;  %v86_v20 = vstv %s638_s14  ;;  %s670_s25 = sld [smem:[#allocation2 + $0x107]]  ;;  %s672_s26 = sld [smem:[#allocation2 + $0x8]]  ;;  %v80_v30 = vstv %s636_s13 }
  0x2b   :  { %v88_v21 = vstv %s640_s15  ;;  %v78_v24 = vadd.f32 %v77_v17, %v76_v16  ;;  %v87_v25 = vmul.f32 %v86_v20, %v630_v0  ;;  %s676_s27 = sld [smem:[#allocation2 + $0x88]]  ;;  %s678_s28 = sld [smem:[#allocation2 + $0x9]]  ;;  %v97_v28 = vstv %s645_s17 }
  0x2c   :  { %v48_v22 = vmul.f32 %v47_v10, %v46_v15  ;;  %v68_v26 = vmax.f32 %v67_v19, 0.0  ;;  %v99_v29 = vstv %s648_s18  ;;  %s683_s0 = sld [smem:[#allocation2 + $0x108]]  ;;  %s685_s29 = sld [smem:[#allocation2 + $0x89]]  ;;  %v91_v32 = vstv %s643_s16 }
  0x2d   :  { %v89_v31 = vadd.f32 %v88_v21, %v87_v25  ;;  %v98_v33 = vmul.f32 %v97_v28, %v630_v0  ;;  %s690_s30 = sld [smem:[#allocation2 + $0xa]]  ;;  %v59_v34 = vmul.f32 %v58_v23, %v57_v18  ;;  %v79_v35 = vmax.f32 %v78_v24, 0.0  ;;  %s697_s4 = sld [smem:[#allocation2 + $0x109]] }
  0x2e   :  { %v108_v36 = vstv %s651_s19  ;;  %v110_v37 = vstv %s653_s20  ;;  %s694_s3 = sld [smem:[#allocation2 + $0x8a]]  ;;  %v49_v38 = vadd.f32 %v48_v22, %v38_v14  ;;  %s699_s5 = sld [smem:[#allocation2 + $0xb]]  ;;  %v701_v42 = vmul.f32 %v69_v27, %v68_v26 }
  0x2f   :  { %v90_v39 = vmax.f32 %v89_v31, 0.0  ;;  %v100_v40 = vadd.f32 %v99_v29, %v98_v33  ;;  %v109_v41 = vmul.f32 %v108_v36, %v630_v0  ;;  %v102_v43 = vstv %s657_s21  ;;  %s706_s6 = sld [smem:[#allocation2 + $0x10a]]  ;;  %s709_s7 = sld [smem:[#allocation2 + $0x8b]] }
  0x30   :  { %v119_v44 = vstv %s659_s22  ;;  %v121_v45 = vstv %s666_s24  ;;  %s711_s8 = sld [smem:[#allocation2 + $0xc]]  ;;  %v81_v50 = vmul.f32 %v80_v30, %v79_v35  ;;  %v113_v51 = vstv %s664_s23  ;;  %s716_s9 = sld [smem:[#allocation2 + $0x10b]] }
  0x31   :  { %v92_v46 = vmul.f32 %v91_v32, %v90_v39  ;;  %v101_v47 = vmax.f32 %v100_v40, 0.0  ;;  %v111_v48 = vadd.f32 %v110_v37, %v109_v41  ;;  %v120_v49 = vmul.f32 %v119_v44, %v630_v0  ;;  %s720_s10 = sld [smem:[#allocation2 + $0x8c]]  ;;  %s722_s1 = sld [smem:[#allocation2 + $0xd]] }
  0x32   :  { %v130_v52 = vstv %s672_s26  ;;  %v141_v53 = vstv %s678_s28  ;;  %v124_v56 = vstv %s670_s25  ;;  %v132_v57 = vstv %s676_s27  ;;  %s729_s11 = sld [smem:[#allocation2 + $0x10c]]  ;;  %s731_s12 = sld [smem:[#allocation2 + $0x8d]] }
  0x33   :  { %v112_v54 = vmax.f32 %v111_v48, 0.0  ;;  %v122_v55 = vadd.f32 %v121_v45, %v120_v49  ;;  %v131_v58 = vmul.f32 %v130_v52, %v630_v0  ;;  %v135_v59 = vstv %s683_s0  ;;  %s735_s13 = sld [smem:[#allocation2 + $0xe]]  ;;  %s741_s15 = sld [smem:[#allocation2 + $0x10d]] }
  0x34   :  { %v142_v60 = vmul.f32 %v141_v53, %v630_v0  ;;  %v143_v61 = vstv %s685_s29  ;;  %v93_v62 = vadd.f32 %v92_v46, %v49_v38  ;;  %v103_v63 = vmul.f32 %v102_v43, %v101_v47  ;;  %s737_s14 = sld [smem:[#allocation2 + $0x8e]]  ;;  %s744_s16 = sld [smem:[#allocation2 + $0xf]] }
  0x35   :  { %v123_v1 = vmax.f32 %v122_v55, 0.0  ;;  %v152_v2 = vstv %s690_s30  ;;  %v133_v3 = vadd.f32 %v132_v57, %v131_v58  ;;  %v154_v6 = vstv %s694_s3  ;;  %s746_s17 = sld [smem:[#allocation2 + $0x8f]]  ;;  %s751_s18 = sld [smem:[#allocation2 + $0x10e]] }
  0x36   :  { %v144_v4 = vadd.f32 %v143_v61, %v142_v60  ;;  %v153_v5 = vmul.f32 %v152_v2, %v630_v0  ;;  %v114_v7 = vmul.f32 %v113_v51, %v112_v54  ;;  %v146_v9 = vstv %s697_s4  ;;  %s754_s19 = sld [smem:[#allocation2 + $0x10]]  ;;  %s756_s20 = sld [smem:[#allocation2 + $0x11]] }
  0x37   :  { %v125_v8 = vmul.f32 %v124_v56, %v123_v1  ;;  %v163_v10 = vstv %s699_s5  ;;  %v134_v11 = vmax.f32 %v133_v3, 0.0  ;;  %v104_v15 = vadd.f32 %v103_v63, %v59_v34  ;;  %s761_s21 = sld [smem:[#allocation2 + $0x10f]]  ;;  %s763_s22 = sld [smem:[#allocation2 + $0x90]] }
  0x38   :  { %v145_v12 = vmax.f32 %v144_v4, 0.0  ;;  %v155_v13 = vadd.f32 %v154_v6, %v153_v5  ;;  %v164_v14 = vmul.f32 %v163_v10, %v630_v0  ;;  %v157_v16 = vstv %s706_s6  ;;  %s766_s23 = sld [smem:[#allocation2 + $0x110]]  ;;  %s768_s24 = sld [smem:[#allocation2 + $0x91]] }
  0x39   :  { %v165_v17 = vstv %s709_s7  ;;  %v174_v18 = vstv %s711_s8  ;;  %v136_v19 = vmul.f32 %v135_v59, %v134_v11  ;;  %v168_v22 = vstv %s716_s9  ;;  %s773_s25 = sld [smem:[#allocation2 + $0x12]]  ;;  %s780_s27 = sld [smem:[#allocation2 + $0x111]] }
  0x3a   :  { %v156_v20 = vmax.f32 %v155_v13, 0.0  ;;  %v166_v21 = vadd.f32 %v165_v17, %v164_v14  ;;  %v147_v23 = vmul.f32 %v146_v9, %v145_v12  ;;  %v175_v24 = vmul.f32 %v174_v18, %v630_v0  ;;  %s777_s26 = sld [smem:[#allocation2 + $0x92]]  ;;  %s782_s28 = sld [smem:[#allocation2 + $0x13]] }
  0x3b   :  { %v176_v25 = vstv %s720_s10  ;;  %v185_v26 = vstv %s722_s1  ;;  %v115_v27 = vadd.f32 %v114_v7, %v701_v42  ;;  %v126_v28 = vadd.f32 %v125_v8, %v81_v50  ;;  %s789_s0 = sld [smem:[#allocation2 + $0x112]]  ;;  %s792_s29 = sld [smem:[#allocation2 + $0x93]] }
  0x3c   :  { %v158_v29 = vmul.f32 %v157_v16, %v156_v20  ;;  %v167_v30 = vmax.f32 %v166_v21, 0.0  ;;  %v177_v31 = vadd.f32 %v176_v25, %v175_v24  ;;  %v179_v32 = vstv %s729_s11  ;;  %s794_s30 = sld [smem:[#allocation2 + $0x14]]  ;;  %s799_s3 = sld [smem:[#allocation2 + $0x113]] }
  0x3d   :  { %v186_v33 = vmul.f32 %v185_v26, %v630_v0  ;;  %v187_v34 = vstv %s731_s12  ;;  %v137_v35 = vadd.f32 %v136_v19, %v93_v62  ;;  %v196_v37 = vstv %s735_s13  ;;  %s803_s4 = sld [smem:[#allocation2 + $0x94]]  ;;  %s805_s5 = sld [smem:[#allocation2 + $0x15]] }
  0x3e   :  { %v169_v36 = vmul.f32 %v168_v22, %v167_v30  ;;  %v198_v38 = vstv %s737_s14  ;;  %v148_v39 = vadd.f32 %v147_v23, %v104_v15  ;;  %v178_v40 = vmax.f32 %v177_v31, 0.0  ;;  %s812_s6 = sld [smem:[#allocation2 + $0x114]]  ;;  %s814_s7 = sld [smem:[#allocation2 + $0x95]] }
  0x3f   :  { %v188_v41 = vadd.f32 %v187_v34, %v186_v33  ;;  %v197_v42 = vmul.f32 %v196_v37, %v630_v0  ;;  %v784_v43 = vadd.f32 %v158_v29, %v115_v27  ;;  %v190_v44 = vstv %s741_s15  ;;  %s818_s8 = sld [smem:[#allocation2 + $0x16]]  ;;  %s824_s10 = sld [smem:[#allocation2 + $0x115]] }
  0x40   :  { %v207_v45 = vstv %s744_s16  ;;  %v209_v46 = vstv %s746_s17  ;;  %v180_v47 = vmul.f32 %v179_v32, %v178_v40  ;;  %v170_v51 = vadd.f32 %v169_v36, %v126_v28  ;;  %s820_s9 = sld [smem:[#allocation2 + $0x96]]  ;;  %s827_s1 = sld [smem:[#allocation2 + $0x17]] }
  0x41   :  { %v189_v48 = vmax.f32 %v188_v41, 0.0  ;;  %v199_v49 = vadd.f32 %v198_v38, %v197_v42  ;;  %v208_v50 = vmul.f32 %v207_v45, %v630_v0  ;;  %v201_v52 = vstv %s751_s18  ;;  %s829_s11 = sld [smem:[#allocation2 + $0x97]]  ;;  %s834_s12 = sld [smem:[#allocation2 + $0x116]] }
  0x42   :  { %v218_v53 = vstv %s754_s19  ;;  %v229_v54 = vstv %s756_s20  ;;  %v212_v57 = vstv %s761_s21  ;;  %v220_v58 = vstv %s763_s22  ;;  %s837_s13 = sld [smem:[#allocation2 + $0x18]]  ;;  %s839_s14 = sld [smem:[#allocation2 + $0x19]] }
  0x43   :  { %v200_v55 = vmax.f32 %v199_v49, 0.0  ;;  %v210_v56 = vadd.f32 %v209_v46, %v208_v50  ;;  %v219_v59 = vmul.f32 %v218_v53, %v630_v0  ;;  %v223_v60 = vstv %s766_s23  ;;  %s844_s15 = sld [smem:[#allocation2 + $0x117]]  ;;  %s846_s16 = sld [smem:[#allocation2 + $0x98]] }
  0x44   :  { %v230_v61 = vmul.f32 %v229_v54, %v630_v0  ;;  %v231_v62 = vstv %s768_s24  ;;  %v181_v63 = vadd.f32 %v180_v47, %v137_v35  ;;  %v191_v1 = vmul.f32 %v190_v44, %v189_v48  ;;  %s849_s17 = sld [smem:[#allocation2 + $0x99]]  ;;  %s853_s18 = sld [smem:[#allocation2 + $0x1a]] }
  0x45   :  { %v211_v2 = vmax.f32 %v210_v56, 0.0  ;;  %v240_v3 = vstv %s773_s25  ;;  %v221_v4 = vadd.f32 %v220_v58, %v219_v59  ;;  %v242_v7 = vstv %s777_s26  ;;  %s858_s19 = sld [smem:[#allocation2 + $0x118]]  ;;  %s860_s20 = sld [smem:[#allocation2 + $0x9a]] }
  0x46   :  { %v232_v5 = vadd.f32 %v231_v62, %v230_v61  ;;  %v241_v6 = vmul.f32 %v240_v3, %v630_v0  ;;  %v202_v8 = vmul.f32 %v201_v52, %v200_v55  ;;  %v234_v10 = vstv %s780_s27  ;;  %s863_s21 = sld [smem:[#allocation2 + $0x119]]  ;;  %s865_s22 = sld [smem:[#allocation2 + $0x1b]] }
  0x47   :  { %v213_v9 = vmul.f32 %v212_v57, %v211_v2  ;;  %v251_v11 = vstv %s782_s28  ;;  %v222_v12 = vmax.f32 %v221_v4, 0.0  ;;  %v192_v16 = vadd.f32 %v191_v1, %v148_v39  ;;  %s871_s23 = sld [smem:[#allocation2 + $0x9b]]  ;;  %s873_s24 = sld [smem:[#allocation2 + $0x1c]] }
  0x48   :  { %v233_v13 = vmax.f32 %v232_v5, 0.0  ;;  %v243_v14 = vadd.f32 %v242_v7, %v241_v6  ;;  %v252_v15 = vmul.f32 %v251_v11, %v630_v0  ;;  %v245_v17 = vstv %s789_s0  ;;  %s880_s25 = sld [smem:[#allocation2 + $0x9c]]  ;;  %s882_s26 = sld [smem:[#allocation2 + $0x1d]] }
  0x49   :  { %v253_v18 = vstv %s792_s29  ;;  %v262_v19 = vstv %s794_s30  ;;  %v224_v20 = vmul.f32 %v223_v60, %v222_v12  ;;  %v256_v23 = vstv %s799_s3  ;;  %s887_s27 = sld [smem:[#allocation2 + $0x11a]]  ;;  %s889_s28 = sld [smem:[#allocation2 + $0x11b]] }
  0x4a   :  { %v244_v21 = vmax.f32 %v243_v14, 0.0  ;;  %v254_v22 = vadd.f32 %v253_v18, %v252_v15  ;;  %v235_v24 = vmul.f32 %v234_v10, %v233_v13  ;;  %v263_v25 = vmul.f32 %v262_v19, %v630_v0  ;;  %s892_s0 = sld [smem:[#allocation2 + $0x11c]]  ;;  %s894_s29 = sld [smem:[#allocation2 + $0x9d]] }
  0x4b   :  { %v264_v26 = vstv %s803_s4  ;;  %v273_v27 = vstv %s805_s5  ;;  %v203_v28 = vadd.f32 %v202_v8, %v784_v43  ;;  %v214_v29 = vadd.f32 %v213_v9, %v170_v51  ;;  %s898_s30 = sld [smem:[#allocation2 + $0x1e]]  ;;  %s905_s4 = sld [smem:[#allocation2 + $0x11d]] }
  0x4c   :  { %v255_v30 = vmax.f32 %v254_v22, 0.0  ;;  %v246_v31 = vmul.f32 %v245_v17, %v244_v21  ;;  %v265_v32 = vadd.f32 %v264_v26, %v263_v25  ;;  %v274_v33 = vmul.f32 %v273_v27, %v630_v0  ;;  %s900_s3 = sld [smem:[#allocation2 + $0x9e]]  ;;  %s908_s5 = sld [smem:[#allocation2 + $0x1f]] }
  0x4d   :  { %v275_v34 = vstv %s814_s7  ;;  %v267_v36 = vstv %s812_s6  ;;  %v284_v37 = vstv %s818_s8  ;;  %v286_v38 = vstv %s820_s9  ;;  %s910_s6 = sld [smem:[#allocation2 + $0x9f]]  ;;  %s914_s7 = sld [smem:[#allocation2 + $0x11e]] }
  0x4e   :  { %v257_v35 = vmul.f32 %v256_v23, %v255_v30  ;;  %v225_v39 = vadd.f32 %v224_v20, %v181_v63  ;;  %v236_v40 = vadd.f32 %v235_v24, %v192_v16  ;;  %v276_v41 = vadd.f32 %v275_v34, %v274_v33  ;;  %s921_s8 = sld [smem:[#allocation2 + $0x11f]]  ;;  %s419_s9 = sld [smem:[#allocation2 + $0x181]] }
  0x4f   :  { %v285_v42 = vmul.f32 %v284_v37, %v630_v0  ;;  %v266_v43 = vmax.f32 %v265_v32, 0.0  ;;  %v278_v44 = vstv %s824_s10  ;;  %v295_v45 = vstv %s827_s1  ;;  %s582_s10 = smov [#allocation7]  }
  0x50   :  { %v297_v46 = vstv %s829_s11  ;;  %v247_v47 = vadd.f32 %v246_v31, %v203_v28  ;;  %v277_v48 = vmax.f32 %v276_v41, 0.0  ;;  %v296_v50 = vmul.f32 %v295_v45, %v630_v0  ;;  %s408_s1 = sshll.u32 %s582_s10, 4  ;;  %s409_s1 = int_to_ptr.vmem [resolvable:$true] %s408_s1 }
  0x51   :  { %v287_v49 = vadd.f32 %v286_v38, %v285_v42  ;;  %v258_v51 = vadd.f32 %v257_v35, %v214_v29  ;;  %v289_v52 = vstv %s834_s12  ;;  %v306_v53 = vstv %s837_s13  ;;  %s552_s11 = scalar_lea.vmem %s409_s1, 128  ;;  %p557_p12 = scmp.lt.s32.totalorder %s409_s1, %s409_s1 }
  0x52   :  { %v317_v54 = vstv %s839_s14  ;;  %v298_v56 = vadd.f32 %v297_v46, %v296_v50  ;;  %v300_v57 = vstv %s844_s15  ;;  %v308_v58 = vstv %s846_s16  ;;  %p553_p11 = scmp.ne.s32.totalorder %s409_s1, %s552_s11  ;;  %p558_p13 = scmp.lt.s32.totalorder %s552_s11, %s552_s11 }
  0x53   :  { %v288_v55 = vmax.f32 %v287_v49, 0.0  ;;  %v268_v59 = vmul.f32 %v267_v36, %v266_v43  ;;  %v307_v60 = vmul.f32 %v306_v53, %v630_v0  ;;  %v318_v61 = vmul.f32 %v317_v54, %v630_v0 }
  0x54   :  { %v319_v62 = vstv %s849_s17  ;;  %v279_v63 = vmul.f32 %v278_v44, %v277_v48  ;;  %v299_v2 = vmax.f32 %v298_v56, 0.0  ;;  %v328_v3 = vstv %s853_s18  ;;  %p559_p0 = por %p558_p13, %p557_p12 }
  0x55   :  { %v290_v1 = vmul.f32 %v289_v52, %v288_v55  ;;  %v309_v4 = vadd.f32 %v308_v58, %v307_v60  ;;  %v320_v5 = vadd.f32 %v319_v62, %v318_v61  ;;  %v329_v6 = vmul.f32 %v328_v3, %v630_v0 }
  0x56   :  { %v330_v7 = vstv %s860_s20  ;;  %v301_v8 = vmul.f32 %v300_v57, %v299_v2  ;;  %v311_v9 = vstv %s858_s19  ;;  %v322_v10 = vstv %s863_s21  ;;  %p560_p1 = pnand %p559_p0, %p553_p11 }
  0x57   :  { %v339_v11 = vstv %s865_s22  ;;  %v310_v12 = vmax.f32 %v309_v4, 0.0  ;;  %v321_v13 = vmax.f32 %v320_v5, 0.0  ;;  %v331_v14 = vadd.f32 %v330_v7, %v329_v6 }
  0x58   :  { %v340_v15 = vmul.f32 %v339_v11, %v630_v0  ;;  %v269_v16 = vadd.f32 %v268_v59, %v225_v39  ;;  %v280_v17 = vadd.f32 %v279_v63, %v236_v40  ;;  %v341_v18 = vstv %s871_s23 }
  0x59   :  { %v350_v19 = vstv %s873_s24  ;;  %v291_v20 = vadd.f32 %v290_v1, %v247_v47  ;;  %v312_v21 = vmul.f32 %v311_v9, %v310_v12  ;;  %v323_v22 = vmul.f32 %v322_v10, %v321_v13 }
  0x5a   :  { %v342_v23 = vadd.f32 %v341_v18, %v340_v15  ;;  %v332_v24 = vmax.f32 %v331_v14, 0.0  ;;  %v351_v25 = vmul.f32 %v350_v19, %v630_v0  ;;  %v352_v26 = vstv %s880_s25 }
  0x5b   :  { %v361_v27 = vstv %s882_s26  ;;  %v302_v28 = vadd.f32 %v301_v8, %v258_v51  ;;  %v333_v29 = vstv %s887_s27  ;;  %v344_v31 = vstv %s889_s28 }
  0x5c   :  { %v343_v30 = vmax.f32 %v342_v23, 0.0  ;;  %v353_v32 = vadd.f32 %v352_v26, %v351_v25  ;;  %v355_v33 = vstv %s892_s0  ;;  %v362_v34 = vmul.f32 %v361_v27, %v630_v0 }
  0x5d   :  { %v363_v35 = vstv %s894_s29  ;;  %v313_v36 = vadd.f32 %v312_v21, %v269_v16  ;;  %v324_v37 = vadd.f32 %v323_v22, %v280_v17  ;;  %v372_v38 = vstv %s898_s30 }
  0x5e   :  { %v374_v39 = vstv %s900_s3  ;;  %v334_v40 = vmul.f32 %v333_v29, %v332_v24  ;;  %v354_v41 = vmax.f32 %v353_v32, 0.0  ;;  %v364_v42 = vadd.f32 %v363_v35, %v362_v34 }
  0x5f   :  { %v373_v43 = vmul.f32 %v372_v38, %v630_v0  ;;  %v345_v44 = vmul.f32 %v344_v31, %v343_v30  ;;  %v366_v45 = vstv %s905_s4  ;;  %v383_v46 = vstv %s908_s5 }
  0x60   :  { %v385_v47 = vstv %s910_s6  ;;  %v356_v48 = vmul.f32 %v355_v33, %v354_v41  ;;  %v365_v49 = vmax.f32 %v364_v42, 0.0  ;;  %v384_v51 = vmul.f32 %v383_v46, %v630_v0 }
  0x61   :  { %v375_v50 = vadd.f32 %v374_v39, %v373_v43  ;;  %v377_v52 = vstv %s914_s7  ;;  %v335_v53 = vadd.f32 %v334_v40, %v291_v20  ;;  %v346_v57 = vadd.f32 %v345_v44, %v302_v28 }
  0x62   :  { %v367_v54 = vmul.f32 %v366_v45, %v365_v49  ;;  %v386_v56 = vadd.f32 %v385_v47, %v384_v51  ;;  %v388_v58 = vstv %s921_s8  ;;  %v357_v59 = vadd.f32 %v356_v48, %v313_v36 }
  0x63   :  { %v376_v55 = vmax.f32 %v375_v50, 0.0  ;;  %v398_v7 = vstv %s419_s9 }
  0x64   :  { %v368_v60 = vadd.f32 %v367_v54, %v324_v37  ;;  %v387_v62 = vmax.f32 %v386_v56, 0.0  ;;  %vm399_vm0 = vcmp.le.f32.partialorder %v630_v0, %v398_v7 }
  0x65   :  { %v378_v61 = vmul.f32 %v377_v52, %v376_v55 }
  0x66   :  { %v389_v1 = vmul.f32 %v388_v58, %v387_v62  ;;  %v391_v3 = vadd.f32 %v368_v60, %v357_v59 }
  0x67   :  { %v379_v63 = vadd.f32 %v378_v61, %v335_v53 }
  0x68   :  { %v390_v2 = vadd.f32 %v389_v1, %v346_v57 }
  0x6a   :  { %v392_v4 = vadd.f32 %v390_v2, %v379_v63 }
  0x6c   :  { %v393_v5 = vadd.f32 %v392_v4, %v391_v3 }
  0x6e   :  { %v394_v6 = vmul.f32 0.5, %v393_v5 }
  0x70   :  { %518 = vtanh.f32 %v394_v6 }
  0x7a   :  { %v519_v8 = vpop.eup %518 }
  0x7b   :  { %v396_v9 = vmul.f32 0.5, %v519_v8 }
  0x7d   :  { %v397_v10 = vadd.f32 0.5, %v396_v9 }
  0x7f   :  { %v400_v11 = vsel %vm399_vm0, %v397_v10, 0.0 }
  0x80   :  { %401 = vst [vmem:[#allocation7] sm:$0xff] %v400_v11 }
  0x81   :  { %563 = shalt.err (!%p560_p1)
}
  0x82   :  { %s564_s14 = scalar_lea.hbm %s950_s2, 128 }
  0x83   :  { %p565_p2 = scmp.ne.s32.totalorder %s950_s2, %s564_s14  ;;  %p568_p3 = scmp.lt.u32.totalorder %s564_s14, %s950_s2 }
  0x85   :  { %p570_p4 = pnand %p568_p3, %p565_p2 }
  0x87   :  { %573 = shalt.err (!%p570_p4)
}
  0x88   :  { %411 = dma.vmem_to_hbm [thread:$0]  %s409_s1, 128, %s950_s2, [#allocation4]  }
  0x89   :  { %578 = dma.done.wait [#allocation4], 128  }
  0x8a   :  { %579 = vsyncadd [#allocation4], 4294967168 }
  0x8b   :  { %415 = vsyncpa [#allocation3], 1 }
  0x8c   :  { %416 = vsyncpa [#allocation4], 1 }
  0x8d   :  { %417 = vsyncpa [#allocation5], 1 }

</bundles_post_ra>
